<compile_context>
chip_gen: v6e
topology: v6e:2x2x1
jax: 0.10.0
libtpu: 0.0.40
codegen_flags: <defaults>
</compile_context>

<pallas_src>
import functools
import math

import jax
import jax.numpy as jnp
from jax.experimental import pallas as pl
from jax.experimental.pallas import tpu as pltpu

LN_EPS = 1e-5


def _cond_embed_kernel(v_ref, wg_ref, varw_ref, beta_ref, o_ref):
    # v_ref:    (BB, N, 1)  values block, N on sublanes, broadcast dim on lanes
    # wg_ref:   (N, E)      (weight - row_mean(weight)) * gamma   (precomputed)
    # varw_ref: (N, 1)      row variance of weight (biased)       (precomputed)
    # beta_ref: (1, E)
    # o_ref:    (BB, N, E)
    v = v_ref[...]                                        # (BB, N, 1)
    var_w = varw_ref[...][None, :, :]                     # (1, N, 1)
    # LayerNorm over E:  (v * w_c) * rsqrt(v^2 * var_w + eps) * gamma + beta
    inv = jax.lax.rsqrt(v * v * var_w + LN_EPS)           # (BB, N, 1)  EUP rsqrt
    scale = v * inv                                       # (BB, N, 1)
    wg = wg_ref[...][None, :, :]                          # (1, N, E)
    beta = beta_ref[...][None, :, :]                      # (1, 1, E)
    o_ref[...] = (scale * wg + beta).astype(o_ref.dtype)


def _choose_block_b(B, N, E, out_itemsize):
    # Target ~1 MB lane-dense output slab per grid step (double-buffered -> ~2 MB
    # VMEM, comfortably under the v7x 32 MiB default scoped limit), but keep at
    # least 4 grid steps when B allows so the parallel axis shards across 2 TCs.
    bytes_per_b = N * E * out_itemsize
    bb = max(1, (1 << 20) // max(1, bytes_per_b))
    bb = min(bb, max(1, pl.cdiv(B, 4)))
    bb = min(bb, B)
    return int(bb)


@functools.partial(jax.jit, static_argnames=("out_dtype", "block_b"))
def condition_stable_embedding(values, weight, gamma, beta, indices=None,
                               out_dtype=jnp.float32, block_b=None):
    """values: (B, N); weight: (num_embeddings, E); gamma/beta: (E,).

    If `indices` (shape (N,)) is given, weight rows are gathered first
    (matches torch.index_select).  Returns (B, N, E) in `out_dtype`.
    """
    if indices is not None:
        # index_select glue in plain JAX; negligible at small N.  For large N/E
        # this could instead use scalar-prefetch + a pl.Element row index_map.
        weight = jnp.take(weight, indices, axis=0)

    B, N = values.shape
    Nw, E = weight.shape
    assert Nw == N, f"values N={N} must match (selected) weight rows {Nw}"

    # ---- one-shot hoisted row statistics (O(N*E), done once in the wrapper) ----
    w = weight.astype(jnp.float32)
    mean_w = jnp.mean(w, axis=-1, keepdims=True)                  # (N, 1)
    w_centered = w - mean_w                                       # (N, E)
    var_w = jnp.mean(w_centered * w_centered, axis=-1, keepdims=True)  # (N, 1)
    wg = w_centered * gamma.astype(jnp.float32)[None, :]          # fold gamma
    beta2 = beta.astype(jnp.float32).reshape(1, E)

    out_itemsize = jnp.dtype(out_dtype).itemsize
    bb = _choose_block_b(B, N, E, out_itemsize) if block_b is None else min(int(block_b), B)
    grid = pl.cdiv(B, bb)
    B_pad = grid * bb

    vals = values.astype(jnp.float32)
    if B_pad != B:
        vals = jnp.pad(vals, ((0, B_pad - B), (0, 0)))
    vals3 = vals.reshape(B_pad, N, 1)                             # N -> sublanes

    cost = pl.CostEstimate(
        flops=5 * B_pad * N * E,
        transcendentals=B_pad * N,
        bytes_accessed=(B_pad * N * E * out_itemsize      # output write
                        + B_pad * N * 4                   # values read
                        + N * E * 4 + N * 4 + E * 4),     # weight stats + beta
    )

    out = pl.pallas_call(
        _cond_embed_kernel,
        out_shape=jax.ShapeDtypeStruct((B_pad, N, E), out_dtype),
        grid_spec=pltpu.PrefetchScalarGridSpec(
            num_scalar_prefetch=0,
            grid=(grid,),
            in_specs=[
                pl.BlockSpec((bb, N, 1), lambda i: (i, 0, 0)),    # values block
                pl.BlockSpec((N, E), lambda i: (0, 0)),           # (w - mean)*gamma
                pl.BlockSpec((N, 1), lambda i: (0, 0)),           # var_w
                pl.BlockSpec((1, E), lambda i: (0, 0)),           # beta
            ],
            out_specs=pl.BlockSpec((bb, N, E), lambda i: (i, 0, 0)),
        ),
        compiler_params=pltpu.CompilerParams(
            dimension_semantics=("parallel",),
        ),
        cost_estimate=cost,
    )(vals3, wg, var_w, beta2)

    if B_pad != B:
        out = out[:B]
    return out


def _reference(values, weight, gamma, beta, indices=None):
    # Direct (non-hoisted) formulation, mirroring the PyTorch module.
    if indices is not None:
        weight = jnp.take(weight, indices, axis=0)
    feats = jnp.einsum("bn,ne->bne", values, weight)
    mean = jnp.mean(feats, axis=-1, keepdims=True)
    var = jnp.mean((feats - mean) ** 2, axis=-1, keepdims=True)
    normed = (feats - mean) / jnp.sqrt(var + LN_EPS)
    return normed * gamma[None, None, :] + beta[None, None, :]


if __name__ == "__main__":
    num_embeddings = 8      # N (number of condition slots)
    embedding_dim = 128     # E (lane-aligned hidden size)
    batch = 2

    key = jax.random.PRNGKey(0)
    k_w, k_v, k_i, k_g, k_b, k_v2 = jax.random.split(key, 6)

    # nn.init.kaiming_uniform_(weight, a=sqrt(5)) on (N, E): bound = 1/sqrt(E).
    bound = 1.0 / math.sqrt(embedding_dim)
    weight = jax.random.uniform(
        k_w, (num_embeddings, embedding_dim), jnp.float32, minval=-bound, maxval=bound
    )
    # Non-trivial affine params to exercise the gamma/beta folding.
    gamma = 1.0 + 0.1 * jax.random.normal(k_g, (embedding_dim,), jnp.float32)
    beta = 0.1 * jax.random.normal(k_b, (embedding_dim,), jnp.float32)

    values = jax.random.normal(k_v, (batch, num_embeddings), jnp.float32)

    # Path 1: indices is None.
    out = condition_stable_embedding(values, weight, gamma, beta)
    out = jax.block_until_ready(out)
    ref = _reference(values, weight, gamma, beta)
    assert out.shape == (batch, num_embeddings, embedding_dim)
    assert jnp.allclose(out, ref, atol=1e-5, rtol=1e-5), "mismatch (indices=None)"

    # Path 2: with indices (index_select on weight rows).
    indices = jax.random.permutation(k_i, num_embeddings)
    out_idx = condition_stable_embedding(values, weight, gamma, beta, indices=indices)
    out_idx = jax.block_until_ready(out_idx)
    ref_idx = _reference(values, weight, gamma, beta, indices=indices)
    assert jnp.allclose(out_idx, ref_idx, atol=1e-5, rtol=1e-5), "mismatch (indices)"

    # Path 3: larger batch exercising BB>1 grid batching + padding of a ragged B.
    values_big = jax.random.normal(k_v2, (10, num_embeddings), jnp.float32)
    out_big = condition_stable_embedding(values_big, weight, gamma, beta)
    out_big = jax.block_until_ready(out_big)
    ref_big = _reference(values_big, weight, gamma, beta)
    assert out_big.shape == (10, num_embeddings, embedding_dim)
    assert jnp.allclose(out_big, ref_big, atol=1e-5, rtol=1e-5), "mismatch (B=10)"

    print("KERNEL_OK")
</pallas_src>

<mosaic_0001>
module attributes {stable_mosaic.version = 11 : i64} {
  func.func @_cond_embed_kernel(%arg0: i32, %arg1: memref<1x8x1xf32, #tpu.memory_space<vmem>>, %arg2: memref<8x128xf32, #tpu.memory_space<vmem>>, %arg3: memref<8x1xf32, #tpu.memory_space<vmem>>, %arg4: memref<1x128xf32, #tpu.memory_space<vmem>>, %arg5: memref<1x8x128xf32, #tpu.memory_space<vmem>>) attributes {dimension_semantics = [#tpu.dimension_semantics<parallel>], iteration_bounds = array<i64: 2>, scalar_prefetch = 0 : i64, scratch_operands = 0 : i64, tpu.core_type = #tpu.core_type<tc>, window_params = [{transform_indices = @transform_0, window_bounds = array<i64: 1, 8, 1>}, {pipeline_mode = #tpu.pipeline_mode<synchronous>, transform_indices = @transform_1, window_bounds = array<i64: 8, 128>}, {pipeline_mode = #tpu.pipeline_mode<synchronous>, transform_indices = @transform_2, window_bounds = array<i64: 8, 1>}, {pipeline_mode = #tpu.pipeline_mode<synchronous>, transform_indices = @transform_3, window_bounds = array<i64: 1, 128>}, {transform_indices = @transform_4, window_bounds = array<i64: 1, 8, 128>}]} {
    %c0 = arith.constant 0 : index
    %c0_0 = arith.constant 0 : index
    %c0_1 = arith.constant 0 : index
    %0 = vector.load %arg1[%c0, %c0_0, %c0_1] : memref<1x8x1xf32, #tpu.memory_space<vmem>>, vector<1x8x1xf32>
    %c0_2 = arith.constant 0 : index
    %c0_3 = arith.constant 0 : index
    %1 = vector.load %arg3[%c0_2, %c0_3] : memref<8x1xf32, #tpu.memory_space<vmem>>, vector<8x1xf32>
    %2 = vector.shape_cast %1 : vector<8x1xf32> to vector<1x8x1xf32>
    %3 = arith.mulf %0, %0 : vector<1x8x1xf32>
    %4 = arith.mulf %3, %2 : vector<1x8x1xf32>
    %cst = arith.constant 9.99999974E-6 : f32
    %5 = vector.broadcast %cst : f32 to vector<1x8x1xf32>
    %6 = arith.addf %4, %5 : vector<1x8x1xf32>
    %7 = math.rsqrt %6 : vector<1x8x1xf32>
    %8 = arith.mulf %0, %7 : vector<1x8x1xf32>
    %c0_4 = arith.constant 0 : index
    %c0_5 = arith.constant 0 : index
    %9 = vector.load %arg2[%c0_4, %c0_5] : memref<8x128xf32, #tpu.memory_space<vmem>>, vector<8x128xf32>
    %10 = vector.shape_cast %9 : vector<8x128xf32> to vector<1x8x128xf32>
    %c0_6 = arith.constant 0 : index
    %c0_7 = arith.constant 0 : index
    %11 = vector.load %arg4[%c0_6, %c0_7] : memref<1x128xf32, #tpu.memory_space<vmem>>, vector<1x128xf32>
    %12 = vector.shape_cast %11 : vector<1x128xf32> to vector<1x1x128xf32>
    %13 = vector.broadcast %8 : vector<1x8x1xf32> to vector<1x8x128xf32>
    %14 = arith.mulf %13, %10 : vector<1x8x128xf32>
    %15 = vector.broadcast %12 : vector<1x1x128xf32> to vector<1x8x128xf32>
    %16 = arith.addf %14, %15 : vector<1x8x128xf32>
    %c0_8 = arith.constant 0 : index
    %c0_9 = arith.constant 0 : index
    %c0_10 = arith.constant 0 : index
    %17 = vector.load %arg5[%c0_8, %c0_9, %c0_10] : memref<1x8x128xf32, #tpu.memory_space<vmem>>, vector<1x8x128xf32>
    tpu.vector_store %arg5[%c0_8, %c0_9, %c0_10], %16 {strides = array<i32>} : memref<1x8x128xf32, #tpu.memory_space<vmem>>, vector<1x8x128xf32>,
    return
  }
  func.func @transform_0(%arg0: i32) -> (i32, i32, i32) {
    %c0_i32 = arith.constant 0 : i32
    %c0_i32_0 = arith.constant 0 : i32
    %c0_i32_1 = arith.constant 0 : i32
    return %arg0, %c0_i32, %c0_i32_0 : i32, i32, i32
  }
  func.func @transform_1(%arg0: i32) -> (i32, i32) {
    %c0_i32 = arith.constant 0 : i32
    %c0_i32_0 = arith.constant 0 : i32
    %c0_i32_1 = arith.constant 0 : i32
    return %c0_i32, %c0_i32_0 : i32, i32
  }
  func.func @transform_2(%arg0: i32) -> (i32, i32) {
    %c0_i32 = arith.constant 0 : i32
    %c0_i32_0 = arith.constant 0 : i32
    %c0_i32_1 = arith.constant 0 : i32
    return %c0_i32, %c0_i32_0 : i32, i32
  }
  func.func @transform_3(%arg0: i32) -> (i32, i32) {
    %c0_i32 = arith.constant 0 : i32
    %c0_i32_0 = arith.constant 0 : i32
    %c0_i32_1 = arith.constant 0 : i32
    return %c0_i32, %c0_i32_0 : i32, i32
  }
  func.func @transform_4(%arg0: i32) -> (i32, i32, i32) {
    %c0_i32 = arith.constant 0 : i32
    %c0_i32_0 = arith.constant 0 : i32
    %c0_i32_1 = arith.constant 0 : i32
    return %arg0, %c0_i32, %c0_i32_0 : i32, i32, i32
  }
}

</mosaic_0001>

<bundles_post_ra>
// kernel: condition_stable_embedding.1
= control target key start
LH: loop header
LB: loop body
LE: loop exit
PB: predicated region body
PF: predicated region fallthrough
CT: control target
= control target key end

     0   :  { %9 = vsyncpa [#allocation3], 0  ;;  %s528_s0 = inlined_call_operand.vmem [shape: f32[2,8,1], index: 0, kind: input, shape index: {}]   ;;  %s529_s1 = inlined_call_operand.vmem [shape: f32[8,128], index: 1, kind: input, shape index: {}]   ;;  %s530_s2 = inlined_call_operand.vmem [shape: f32[8,1], index: 2, kind: input, shape index: {}]   ;;  %s531_s3 = inlined_call_operand.vmem [shape: f32[1,128], index: 3, kind: input, shape index: {}]   ;;  %s532_s4 = inlined_call_operand.hbm [shape: f32[2,8,128], index: 4, kind: output, shape index: {}]  }
   0x1   :  { %11 = vsyncpa [#allocation3 + $0x1], 0  ;;  %s432_s15 = smov 0   ;;  %s434_s16 = smov 0  }
   0x2   :  { %s436_s17 = smov 0   ;;  %s438_s18 = smov 0  }
   0x3 LB: > { %s453_s19 = sadd.s32 4294967295, %s403_s18   ;;  %s289_s20 = sadd.s32 4294967294, %s403_s18   ;;  %s403_s18 = sphi %s438_s18, %s538_s18   ;;  %s399_s17 = sphi %s436_s17, %s537_s17   ;;  %s395_s16 = sphi %s434_s16, %s536_s16   ;;  %s391_s15 = sphi %s432_s15, %s535_s15  }
   0x4   : > { %s457_s21 = sadd.s32 1, %s403_s18   ;;  %s113_s22 = sadd.s32 1, %s399_s17 }
   0x5   : > { %s110_s23 = ssub.s32 %s403_s18, %s457_s21  ;;  %p123_p0 = scmp.ne.s32.totalorder %s399_s17, %s395_s16 }
   0x6   : > { %p111_p1 = scmp.eq.s32.totalorder %s110_s23, 0  ;;  %p124_p2 = scmp.eq.s32.totalorder %s453_s19, 1 }
   0x7   : > { %p129_p3 = scmp.ne.s32.totalorder %s395_s16, %s391_s15  ;;  %p130_p4 = scmp.eq.s32.totalorder %s289_s20, 1 }
   0x8   : > { %s468_s24 = scalar_select %p111_p1, %s399_s17, %s113_s22  }
   0x9   : > { %p470_p5 = por %p124_p2, %p123_p0  ;;  %p474_p6 = por %p130_p4, %p129_p3 }
   0xa   : > { %p292_p7 = scmp.ge.s32.totalorder %s403_s18, 1  ;;  %p164_p8 = scmp.lt.s32.totalorder %s403_s18, 3 }
   0xc   : > { %p165_p9 = pnand %p292_p7, %p164_p8 }
   0xd   : > { %p189_p10 = scmp.lt.s32.totalorder (!%p165_p9), %s453_s19, 1  ;;  %s186_s8 = sand.u32 (!%p165_p9), 1, %s395_s16  }
   0xe   : > { %168 = sbr.rel (%p165_p9) target bundleno = 187 (0xbb), region = 36  ;;  %s293_s9 = sshll.u32 (!%p165_p9), %s186_s8, 3 }
   0xf   : > { %s297_s14 = sshll.u32 (!%p165_p9), %s453_s19, 7  ;;  %s188_s20 = scalar_lea.vmem (!%p165_p9), [#allocation2], %s293_s9 }
  0x10   : > { %s230_s22 = sshll.u32 (!%p165_p9), %s188_s20, 4  ;;  %s217_s29 = scalar_lea.sflag (!%p165_p9), [#allocation3], %s186_s8  ;;  %s231_s22 = int_to_ptr.vmem [resolvable:$true] %s230_s22 }
  0x11   : > { %s343_s30 = scalar_lea.vmem (!%p165_p9), %s231_s22, 128 }
  0x12   : > { %p344_p11 = scmp.ne.s32.totalorder (!%p165_p9), %s231_s22, %s343_s30 }
  0x13   : > { %v405_v0 = vmov 0   ;;  %s190_s27 = scalar_select %p189_p10, %s453_s19, 1  ;;  %v194_v2 = vld [vmem:[%s530_s2] sm:$0xff] }
  0x14   : > { %340 = vset.pattern.permute.xlu0 %v405_v0  ;;  %v200_v8 = vld [vmem:[%s529_s1] sm:$0xff]  ;;  %p345_p12 = pnand %p344_p11, %p470_p5 }
  0x15   : > { %s294_s28 = sshll.u32 %s190_s27, 3  ;;  %v295_v9 = vld [vmem:[%s531_s3] ss:$0 sm:$0xff] }
  0x16   : > { %s192_s5 = scalar_lea.vmem %s528_s0, %s294_s28  ;;  %s228_s28 = scalar_lea.hbm %s532_s4, %s297_s14 }
  0x17   : > { %v193_v1 = vld [vmem:[%s192_s5] sm:$0xff]  ;;  %p346_p13 = pneg %p345_p12  ;;  %s406_s5 = smov [#allocation2]  }
  0x18   : > { %v195_v3 = vmul.f32 %v193_v1, %v193_v1  ;;  %s347_s6 = sshll.u32 %s406_s5, 4  ;;  %s348_s6 = int_to_ptr.vmem [resolvable:$false] %s347_s6 }
  0x19   : > { %s349_s19 = scalar_lea.vmem %s348_s6, 256  ;;  %p350_p0 = scmp.lt.s32.totalorder %s231_s22, %s348_s6 }
  0x1a   : > { %v196_v4 = vmul.f32 %v195_v3, %v194_v2  ;;  %p351_p1 = scmp.lt.s32.totalorder %s349_s19, %s343_s30 }
  0x1c   : > { %v197_v5 = vadd.f32 1e-05, %v196_v4  ;;  %p352_p2 = por %p351_p1, %p350_p0 }
  0x1e   : > { %341 = vrsqrt.f32 %v197_v5  ;;  %p353_p3 = pnand %p352_p2, %p346_p13 }
  0x2b   : > { %v342_v6 = vpop.eup %341 }
  0x2c   : > { %v199_v7 = vmul.f32 %v342_v6, %v193_v1 }
  0x2e   : > { %204 = vperm.xlu0 %340, %v199_v7  }
  0xa9   : > { %v205_v10 = vpop.permute.xlu0 %204 }
  0xaa   : > { %v207_v11 = vmul.f32 %v205_v10, %v200_v8 }
  0xac   : > { %v214_v12 = vadd.f32 %v295_v9, %v207_v11 }
  0xae   : > { %215 = vst [vmem:[%s188_s20] sm:$0xff] %v214_v12 }
  0xaf   : > { %356 = shalt.err (!%p353_p3)
}
  0xb0   : > { %s357_s7 = scalar_lea.hbm %s228_s28, 128  ;;  %s361_s10 = scalar_lea.hbm %s532_s4, 256 }
  0xb1   : > { %p358_p4 = scmp.ne.s32.totalorder %s228_s28, %s357_s7  ;;  %p362_p9 = scmp.lt.s32.totalorder %s228_s28, %s532_s4 }
  0xb2   : > { %p363_p10 = scmp.lt.s32.totalorder %s361_s10, %s357_s7 }
  0xb3   : > { %p359_p7 = pnand %p358_p4, %p470_p5 }
  0xb4   : > { %p364_p11 = por %p363_p10, %p362_p9 }
  0xb5   : > { %p360_p8 = pneg %p359_p7 }
  0xb7   : > { %p365_p12 = pnand %p364_p11, %p360_p8 }
  0xb9   : > { %368 = shalt.err (!%p365_p12)
}
  0xba   : > { %300 = dma.vmem_to_hbm [thread:$0]  (%p470_p5), %s231_s22, 128, %s228_s28, %s217_s29  }
  0xbb PF: > { %p306_p13 = scmp.ge.s32.totalorder %s403_s18, 2  ;;  %s242_s13 = sand.u32 1, %s391_s15  }
  0xbc   : > { %s243_s14 = scalar_lea.sflag [#allocation3], %s242_s13 }
  0xbd   : > { %p303_p0 = pnand %p306_p13, %p474_p6 }
  0xbf   : > { %p304_p1 = pneg %p303_p0 }
  0xc1   : > { %386 = dma.done.wait (%p304_p1), %s243_s14, 128  }
  0xc2   : > { %388 = vsyncadd (%p304_p1), %s243_s14, 4294967168  ;;  %p14_p2 = scmp.ge.s32.totalorder %s457_s21, 4   ;;  %s535_s15 = smov %s395_s16 }
  0xc3   : > { %s536_s16 = smov %s399_s17  ;;  %s537_s17 = smov %s468_s24 }
  0xc4   : > { %s538_s18 = smov %s457_s21  ;;  %16 = sbr.rel (!%p14_p2) target bundleno = 3 (0x3), region = 71 }
  0xc9   :  { %248 = vsyncpa [#allocation3], 1 }
  0xca   :  { %250 = vsyncpa [#allocation3 + $0x1], 1 }

</bundles_post_ra>
